<compile_context>
chip_gen: v7x
topology: tpu7x:2x2x1
jax: 0.10.0
libtpu: 0.0.40
codegen_flags: <defaults>
</compile_context>

<pallas_src>
import jax
import jax.numpy as jnp
from jax.experimental import pallas as pl
from jax.experimental.pallas import tpu as pltpu


def _attention_kernel(x_ref, bias_ref, w1t_ref, b1_ref, w2rep_ref, out_ref):
    S, bt, H = x_ref.shape          # bt is a multiple of 8 (sublane-aligned)
    Hc = w2rep_ref.shape[1]         # min(H, 128): lane-replication cap for w2

    x3 = x_ref[...]                 # (S, bt, H) f32
    # Leading-dim merge only; bt is a sublane multiple so this is a free
    # re-view (no sublane repacking).
    x2d = x3.reshape(S * bt, H)

    # --- generator: Linear(H, H) -> tanh, one clean 2-D MXU matmul ----------
    h2d = jnp.tanh(
        jnp.dot(x2d, w1t_ref[...],
                preferred_element_type=jnp.float32,
                precision=jax.lax.Precision.HIGHEST)
        + b1_ref[...]               # (1, H) broadcasts over rows
    )                               # (S*bt, H)

    # --- Linear(H, 1), lane-replicated on the MXU ---------------------------
    # Every column of w2rep equals w2, so the MXU emits the scalar score
    # already broadcast across Hc lanes: no cross-lane (XLU) reduce and no
    # later lane-broadcast of the attention weights.
    srep = jnp.dot(h2d, w2rep_ref[...],
                   preferred_element_type=jnp.float32,
                   precision=jax.lax.Precision.HIGHEST)   # (S*bt, Hc)

    # --- "+ b2" and masked_fill_(mask, -inf), both folded into one additive
    #     lane-wide bias prepared in the wrapper ------------------------------
    s3 = srep.reshape(S, bt, Hc) + bias_ref[...]          # free split (bt % 8 == 0)

    # --- softmax over the sequence axis (dim 0), normalization deferred -----
    m = jnp.max(s3, axis=0, keepdims=True)                # (1, bt, Hc)
    e3 = jnp.exp(s3 - m)                                  # (S, bt, Hc)  (EUP)
    denom = jnp.sum(e3, axis=0)                           # (bt, Hc)
    inv = pl.reciprocal(denom)                            # exact (approx=False)

    if Hc != H:
        # H > 128: the score is only replicated across the first 128 lanes;
        # broadcast once here, only for the final weighted sum.
        e3 = jnp.broadcast_to(e3[:, :, :1], (S, bt, H))
        inv = jnp.broadcast_to(inv[:, :1], (bt, H))

    # --- (inputs * a).sum(0)  ==  sum(inputs * e, 0) * (1 / denom) -----------
    u = jnp.sum(x3 * e3, axis=0)                          # (bt, H)
    out_ref[...] = (u * inv).astype(out_ref.dtype)


def attention_forward(inputs, mask, w1, b1, w2, b2, *, b_tile=8):
    """Forward pass of the PyTorch `Attention` module.

    inputs: (S, B, H) float32;  mask: (S, B) bool (True == masked out).
    Returns (B, H).

    `b_tile` is the batch-column tile per grid step (multiple of 8).  The grid
    axis over batch tiles is marked "parallel" so that on multi-TC parts (v7x)
    independent tiles are sharded across TensorCores.  To amortize launch
    overhead across many module invocations, stack the problems along B and
    raise `b_tile` so each grid step moves >= 512 lane-dense rows.
    """
    S, B, H = inputs.shape
    assert b_tile % 8 == 0, "b_tile must be a sublane multiple (8)"
    Hc = min(H, 128)                    # cap w2 lane-replication at one lane tile
    Bp = pl.cdiv(B, b_tile) * b_tile    # pad B to a multiple of the tile

    x = inputs.astype(jnp.float32)
    mask_b = mask
    if Bp != B:
        x = jnp.pad(x, ((0, 0), (0, Bp - B), (0, 0)))
        mask_b = jnp.pad(mask_b, ((0, 0), (0, Bp - B)))   # padded columns unmasked

    # Additive score bias: b2 + (-1e30 where masked).  Built lane-wide in HBM
    # so the kernel does a single vector add (no compare/select, no XLU
    # lane-broadcast); the large finite negative avoids -inf/NaN hazards.
    bias = jnp.where(mask_b, jnp.float32(-1e30), jnp.float32(0.0)) \
        + b2.reshape(()).astype(jnp.float32)
    bias = jnp.broadcast_to(bias[:, :, None], (S, Bp, Hc)).astype(jnp.float32)

    w1t = w1.T.astype(jnp.float32)                      # torch Linear: y = x @ W^T + b
    b1_2d = b1.reshape(1, H).astype(jnp.float32)
    w2rep = jnp.broadcast_to(w2.reshape(H, 1), (H, Hc)).astype(jnp.float32)

    out = pl.pallas_call(
        _attention_kernel,
        out_shape=jax.ShapeDtypeStruct((Bp, H), inputs.dtype),
        grid_spec=pltpu.PrefetchScalarGridSpec(
            num_scalar_prefetch=0,
            grid=(Bp // b_tile,),
            in_specs=[
                pl.BlockSpec((S, b_tile, H), lambda i: (0, i, 0)),    # inputs
                pl.BlockSpec((S, b_tile, Hc), lambda i: (0, i, 0)),   # score bias
                pl.BlockSpec((H, H), lambda i: (0, 0)),               # W1^T
                pl.BlockSpec((1, H), lambda i: (0, 0)),               # b1
                pl.BlockSpec((H, Hc), lambda i: (0, 0)),              # replicated w2
            ],
            out_specs=pl.BlockSpec((b_tile, H), lambda i: (i, 0)),
        ),
        compiler_params=pltpu.CompilerParams(
            dimension_semantics=("parallel",)),
    )(x, bias, w1t, b1_2d, w2rep)
    # Note: for H < 128 the (b_tile, H) output tile is lane-sparse; packing it
    # lane-dense in-kernel would need a sublane->lane relayout (XLU) that costs
    # more than the masked store at this size, so it is left as-is.
    return out[:B]


if __name__ == "__main__":
    S, B, H = 8, 4, 32
    key = jax.random.PRNGKey(0)
    k1, k2, k3, k4, k5, k6 = jax.random.split(key, 6)

    inputs = jax.random.normal(k1, (S, B, H), jnp.float32)
    # True = masked; ensure at least one unmasked position per batch column
    mask = jax.random.bernoulli(k2, 0.3, (S, B))
    mask = mask.at[0].set(False)

    # deterministic parameters (shapes from nn.Linear(H,H) and nn.Linear(H,1))
    w1 = jax.random.normal(k3, (H, H), jnp.float32) * 0.1   # Linear(H, H).weight
    b1 = jax.random.normal(k4, (H,), jnp.float32) * 0.1     # Linear(H, H).bias
    w2 = jax.random.normal(k5, (1, H), jnp.float32) * 0.1   # Linear(H, 1).weight
    b2 = jax.random.normal(k6, (1,), jnp.float32) * 0.1     # Linear(H, 1).bias

    out = attention_forward(inputs, mask, w1, b1, w2, b2)
    jax.block_until_ready(out)

    # pure-JAX reference (mirrors the PyTorch forward exactly; HIGHEST matmul
    # precision to match the kernel's f32 MXU passes)
    def ref(x, m):
        hp = jax.lax.Precision.HIGHEST
        h = jnp.tanh(jnp.dot(x, w1.T, precision=hp) + b1)
        s = jnp.dot(h, w2.T, precision=hp) + b2              # (S, B, 1)
        s = jnp.where(m[..., None], -jnp.inf, s)
        a = jax.nn.softmax(s, axis=0)
        return (x * a).sum(axis=0)

    expected = ref(inputs, mask)
    # Tight tolerance: exact reciprocal + HIGHEST-precision matmuls now.
    assert jnp.allclose(out, expected, atol=1e-4, rtol=1e-4), (out, expected)
    print("KERNEL_OK")
</pallas_src>

<mosaic_0001>
module attributes {stable_mosaic.version = 11 : i64} {
  func.func @_attention_kernel(%arg0: i32, %arg1: memref<8x8x32xf32, #tpu.memory_space<vmem>>, %arg2: memref<8x8x32xf32, #tpu.memory_space<vmem>>, %arg3: memref<32x32xf32, #tpu.memory_space<vmem>>, %arg4: memref<1x32xf32, #tpu.memory_space<vmem>>, %arg5: memref<32x32xf32, #tpu.memory_space<vmem>>, %arg6: memref<8x32xf32, #tpu.memory_space<vmem>>) attributes {dimension_semantics = [#tpu.dimension_semantics<parallel>], iteration_bounds = array<i64: 1>, scalar_prefetch = 0 : i64, scratch_operands = 0 : i64, tpu.core_type = #tpu.core_type<tc>, window_params = [{transform_indices = @transform_0, window_bounds = array<i64: 8, 8, 32>}, {transform_indices = @transform_1, window_bounds = array<i64: 8, 8, 32>}, {pipeline_mode = #tpu.pipeline_mode<synchronous>, transform_indices = @transform_2, window_bounds = array<i64: 32, 32>}, {pipeline_mode = #tpu.pipeline_mode<synchronous>, transform_indices = @transform_3, window_bounds = array<i64: 1, 32>}, {pipeline_mode = #tpu.pipeline_mode<synchronous>, transform_indices = @transform_4, window_bounds = array<i64: 32, 32>}, {transform_indices = @transform_5, window_bounds = array<i64: 8, 32>}]} {
    %c0 = arith.constant 0 : index
    %c0_0 = arith.constant 0 : index
    %c0_1 = arith.constant 0 : index
    %0 = vector.load %arg1[%c0, %c0_0, %c0_1] : memref<8x8x32xf32, #tpu.memory_space<vmem>>, vector<8x8x32xf32>
    %1 = vector.shape_cast %0 : vector<8x8x32xf32> to vector<64x32xf32>
    %c0_2 = arith.constant 0 : index
    %c0_3 = arith.constant 0 : index
    %2 = vector.load %arg3[%c0_2, %c0_3] : memref<32x32xf32, #tpu.memory_space<vmem>>, vector<32x32xf32>
    %cst = arith.constant dense<0.000000e+00> : vector<64x32xf32>
    %3 = tpu.matmul %1, %2, %cst {dimension_numbers = #tpu.dot_dimension_numbers<[1], [0], [0], [1], [0, 0, 1, 1], [], []>, precision = #tpu.contract_precision<fp32>} : vector<64x32xf32>, vector<32x32xf32>, vector<64x32xf32> -> vector<64x32xf32>
    %c0_4 = arith.constant 0 : index
    %c0_5 = arith.constant 0 : index
    %4 = vector.load %arg4[%c0_4, %c0_5] : memref<1x32xf32, #tpu.memory_space<vmem>>, vector<1x32xf32>
    %5 = vector.broadcast %4 : vector<1x32xf32> to vector<64x32xf32>
    %6 = arith.addf %3, %5 : vector<64x32xf32>
    %7 = math.tanh %6 : vector<64x32xf32>
    %c0_6 = arith.constant 0 : index
    %c0_7 = arith.constant 0 : index
    %8 = vector.load %arg5[%c0_6, %c0_7] : memref<32x32xf32, #tpu.memory_space<vmem>>, vector<32x32xf32>
    %cst_8 = arith.constant dense<0.000000e+00> : vector<64x32xf32>
    %9 = tpu.matmul %7, %8, %cst_8 {dimension_numbers = #tpu.dot_dimension_numbers<[1], [0], [0], [1], [0, 0, 1, 1], [], []>, precision = #tpu.contract_precision<fp32>} : vector<64x32xf32>, vector<32x32xf32>, vector<64x32xf32> -> vector<64x32xf32>
    %10 = vector.shape_cast %9 : vector<64x32xf32> to vector<8x8x32xf32>
    %c0_9 = arith.constant 0 : index
    %c0_10 = arith.constant 0 : index
    %c0_11 = arith.constant 0 : index
    %11 = vector.load %arg2[%c0_9, %c0_10, %c0_11] : memref<8x8x32xf32, #tpu.memory_space<vmem>>, vector<8x8x32xf32>
    %12 = arith.addf %10, %11 : vector<8x8x32xf32>
    %cst_12 = arith.constant dense<0xFF800000> : vector<8x32xf32>
    %13 = vector.multi_reduction <maximumf>, %12, %cst_12 [0] : vector<8x8x32xf32> to vector<8x32xf32>
    %14 = vector.shape_cast %13 : vector<8x32xf32> to vector<1x8x32xf32>
    %15 = vector.broadcast %14 : vector<1x8x32xf32> to vector<8x8x32xf32>
    %16 = arith.subf %12, %15 : vector<8x8x32xf32>
    %17 = math.exp %16 : vector<8x8x32xf32>
    %cst_13 = arith.constant dense<0.000000e+00> : vector<8x32xf32>
    %18 = vector.multi_reduction <add>, %17, %cst_13 [0] : vector<8x8x32xf32> to vector<8x32xf32>
    %19 = tpu.reciprocal %18 : vector<8x32xf32> -> vector<8x32xf32>
    %20 = arith.mulf %0, %17 : vector<8x8x32xf32>
    %cst_14 = arith.constant dense<0.000000e+00> : vector<8x32xf32>
    %21 = vector.multi_reduction <add>, %20, %cst_14 [0] : vector<8x8x32xf32> to vector<8x32xf32>
    %22 = arith.mulf %21, %19 : vector<8x32xf32>
    %c0_15 = arith.constant 0 : index
    %c0_16 = arith.constant 0 : index
    %23 = vector.load %arg6[%c0_15, %c0_16] : memref<8x32xf32, #tpu.memory_space<vmem>>, vector<8x32xf32>
    tpu.vector_store %arg6[%c0_15, %c0_16], %22 {strides = array<i32>} : memref<8x32xf32, #tpu.memory_space<vmem>>, vector<8x32xf32>,
    return
  }
  func.func @transform_0(%arg0: i32) -> (i32, i32, i32) {
    %c0_i32 = arith.constant 0 : i32
    %c0_i32_0 = arith.constant 0 : i32
    %c0_i32_1 = arith.constant 0 : i32
    return %c0_i32, %arg0, %c0_i32_0 : i32, i32, i32
  }
  func.func @transform_1(%arg0: i32) -> (i32, i32, i32) {
    %c0_i32 = arith.constant 0 : i32
    %c0_i32_0 = arith.constant 0 : i32
    %c0_i32_1 = arith.constant 0 : i32
    return %c0_i32, %arg0, %c0_i32_0 : i32, i32, i32
  }
  func.func @transform_2(%arg0: i32) -> (i32, i32) {
    %c0_i32 = arith.constant 0 : i32
    %c0_i32_0 = arith.constant 0 : i32
    %c0_i32_1 = arith.constant 0 : i32
    return %c0_i32, %c0_i32_0 : i32, i32
  }
  func.func @transform_3(%arg0: i32) -> (i32, i32) {
    %c0_i32 = arith.constant 0 : i32
    %c0_i32_0 = arith.constant 0 : i32
    %c0_i32_1 = arith.constant 0 : i32
    return %c0_i32, %c0_i32_0 : i32, i32
  }
  func.func @transform_4(%arg0: i32) -> (i32, i32) {
    %c0_i32 = arith.constant 0 : i32
    %c0_i32_0 = arith.constant 0 : i32
    %c0_i32_1 = arith.constant 0 : i32
    return %c0_i32, %c0_i32_0 : i32, i32
  }
  func.func @transform_5(%arg0: i32) -> (i32, i32) {
    %c0_i32 = arith.constant 0 : i32
    %c0_i32_0 = arith.constant 0 : i32
    return %arg0, %c0_i32 : i32, i32
  }
}

</mosaic_0001>

<bundles_post_ra>
// kernel: tpu_custom_call.1
= control target key start
LH: loop header
LB: loop body
LE: loop exit
PB: predicated region body
PF: predicated region fallthrough
CT: control target
= control target key end

     0   :  { %10 = vsyncpa [#allocation3], 0  ;;  %s3047_s0 = inlined_call_operand.hbm [shape: f32[8,8,32], index: 0, kind: input, shape index: {}]   ;;  %s3048_s1 = inlined_call_operand.hbm [shape: f32[8,8,32], index: 1, kind: input, shape index: {}]   ;;  %s3049_s2 = inlined_call_operand.hbm [shape: f32[32,32], index: 2, kind: input, shape index: {}]   ;;  %s3050_s3 = inlined_call_operand.vmem [shape: f32[1,32], index: 3, kind: input, shape index: {}]   ;;  %s3051_s4 = inlined_call_operand.hbm [shape: f32[32,32], index: 4, kind: input, shape index: {}]   ;;  %s3052_s5 = inlined_call_operand.hbm [shape: f32[8,32], index: 5, kind: output, shape index: {}]  }
   0x1   :  { %11 = vsyncpa [#allocation6], 0 }
   0x2   :  { %12 = vsyncpa [#allocation9], 0 }
   0x3   :  { %13 = vsyncpa [#allocation4], 0  ;;  %s2569_s18 = smov [#allocation5]   ;;  %s2570_s20 = smov [#allocation2]  }
   0x4   :  { %s31_s19 = sshll.u32 %s2569_s18, 4  ;;  %s19_s21 = sshll.u32 %s2570_s20, 4  ;;  %s32_s19 = int_to_ptr.vmem [resolvable:$true] %s31_s19  ;;  %s2606_s21 = int_to_ptr.vmem [resolvable:$true] %s19_s21 }
   0x5   :  { %s2451_s24 = scalar_lea.hbm %s3048_s1, 1024 }
   0x6   :  { %p2452_p0 = scmp.ne.s32.totalorder %s3048_s1, %s2451_s24  ;;  %p2455_p1 = scmp.lt.u32.totalorder %s2451_s24, %s3048_s1 }
   0x8   :  { %p2457_p2 = pnand %p2455_p1, %p2452_p0 }
   0xa   :  { %2460 = shalt.err (!%p2457_p2)
}
   0xb   :  { %s2461_s29 = scalar_lea.vmem %s32_s19, 1024  ;;  %p2466_p4 = scmp.lt.s32.totalorder %s32_s19, %s32_s19 }
   0xc   :  { %p2462_p3 = scmp.ne.s32.totalorder %s32_s19, %s2461_s29  ;;  %p2467_p5 = scmp.lt.s32.totalorder %s2461_s29, %s2461_s29 }
   0xe   :  { %p2468_p6 = por %p2467_p5, %p2466_p4 }
  0x10   :  { %p2469_p7 = pnand %p2468_p6, %p2462_p3 }
  0x12   :  { %2472 = shalt.err (!%p2469_p7)
}
  0x13   :  { %s2571_s30 = smov 128   ;;  %s2572_s6 = smov 8  }
  0x14   :  { %37 = dma.hbm_to_vmem [thread:$0]  %s3048_s1, 1024, %s32_s19, [#allocation6], %s2571_s30, %s2571_s30, %s2572_s6  }
  0x15   :  { %s2473_s11 = scalar_lea.hbm %s3047_s0, 1024 }
  0x16   :  { %p2474_p8 = scmp.ne.s32.totalorder %s3047_s0, %s2473_s11  ;;  %p2477_p9 = scmp.lt.u32.totalorder %s2473_s11, %s3047_s0 }
  0x18   :  { %p2479_p10 = pnand %p2477_p9, %p2474_p8 }
  0x1a   :  { %2482 = shalt.err (!%p2479_p10)
}
  0x1b   :  { %s2483_s16 = scalar_lea.vmem %s2606_s21, 1024  ;;  %p2488_p12 = scmp.lt.s32.totalorder %s2606_s21, %s2606_s21 }
  0x1c   :  { %p2484_p11 = scmp.ne.s32.totalorder %s2606_s21, %s2483_s16  ;;  %p2489_p13 = scmp.lt.s32.totalorder %s2483_s16, %s2483_s16 }
  0x1e   :  { %p2490_p0 = por %p2489_p13, %p2488_p12 }
  0x20   :  { %p2491_p1 = pnand %p2490_p0, %p2484_p11 }
  0x22   :  { %2494 = shalt.err (!%p2491_p1)
}
  0x23   :  { %25 = dma.hbm_to_vmem [thread:$0]  %s3047_s0, 1024, %s2606_s21, [#allocation3], %s2571_s30, %s2571_s30, %s2572_s6  }
  0x24   :  { %s2573_s18 = smov [#allocation7]   ;;  %s2574_s20 = smov [#allocation8]  }
  0x25   :  { %s43_s19 = sshll.u32 %s2573_s18, 4  ;;  %s57_s22 = sshll.u32 %s2574_s20, 4  ;;  %s44_s19 = int_to_ptr.vmem [resolvable:$true] %s43_s19  ;;  %s2643_s22 = int_to_ptr.vmem [resolvable:$true] %s57_s22 }
  0x26   :  { %s2495_s25 = scalar_lea.hbm %s3049_s2, 512 }
  0x27   :  { %p2496_p2 = scmp.ne.s32.totalorder %s3049_s2, %s2495_s25  ;;  %p2499_p3 = scmp.lt.u32.totalorder %s2495_s25, %s3049_s2 }
  0x29   :  { %p2501_p4 = pnand %p2499_p3, %p2496_p2 }
  0x2b   :  { %2504 = shalt.err (!%p2501_p4)
}
  0x2c   :  { %s2505_s0 = scalar_lea.vmem %s44_s19, 512  ;;  %p2510_p6 = scmp.lt.s32.totalorder %s44_s19, %s44_s19 }
  0x2d   :  { %p2506_p5 = scmp.ne.s32.totalorder %s44_s19, %s2505_s0  ;;  %p2511_p7 = scmp.lt.s32.totalorder %s2505_s0, %s2505_s0 }
  0x2f   :  { %p2512_p8 = por %p2511_p7, %p2510_p6 }
  0x31   :  { %p2513_p9 = pnand %p2512_p8, %p2506_p5 }
  0x33   :  { %2516 = shalt.err (!%p2513_p9)
}
  0x34   :  { %49 = dma.hbm_to_vmem [thread:$0]  %s3049_s2, 512, %s44_s19, [#allocation6], %s2571_s30, %s2571_s30, %s2572_s6  }
  0x35   :  { %s2517_s10 = scalar_lea.hbm %s3051_s4, 512 }
  0x36   :  { %p2518_p10 = scmp.ne.s32.totalorder %s3051_s4, %s2517_s10  ;;  %p2521_p11 = scmp.lt.u32.totalorder %s2517_s10, %s3051_s4 }
  0x38   :  { %p2523_p12 = pnand %p2521_p11, %p2518_p10 }
  0x3a   :  { %2526 = shalt.err (!%p2523_p12)
}
  0x3b   :  { %s2527_s15 = scalar_lea.vmem %s2643_s22, 512  ;;  %p2532_p0 = scmp.lt.s32.totalorder %s2643_s22, %s2643_s22 }
  0x3c   :  { %p2528_p13 = scmp.ne.s32.totalorder %s2643_s22, %s2527_s15  ;;  %p2533_p1 = scmp.lt.s32.totalorder %s2527_s15, %s2527_s15 }
  0x3e   :  { %p2534_p2 = por %p2533_p1, %p2532_p0 }
  0x40   :  { %p2535_p3 = pnand %p2534_p2, %p2528_p13 }
  0x42   :  { %2538 = shalt.err (!%p2535_p3)
}
  0x43   :  { %63 = dma.hbm_to_vmem [thread:$0]  %s3051_s4, 512, %s2643_s22, [#allocation9], %s2571_s30, %s2571_s30, %s2572_s6  }
  0x44   :  { %2561 = dma.done.wait [#allocation3], 1024  }
  0x45   :  { %2562 = vsyncadd [#allocation3], 4294966272 }
  0x46   :  { %2563 = dma.done.wait [#allocation6], 1536  }
  0x47   :  { %2564 = vsyncadd [#allocation6], 4294965760 }
  0x48   :  { %2565 = dma.done.wait [#allocation9], 512  }
  0x49   :  { %2566 = vsyncadd [#allocation9], 4294966784  ;;  %vm95_vm0 = vcmask 261120   ;;  %v84_v0 = vld [vmem:[#allocation7] sm:$0xff]  ;;  %v85_v1 = vld [vmem:[#allocation7 + $0x8] sm:$0xff] }
  0x4a   :  { %v86_v2 = vld [vmem:[#allocation7 + $0x10] sm:$0xff]  ;;  %v121_v3 = vand.u32 4294901760, %v84_v0  ;;  %v124_v4 = vand.u32 4294901760, %v85_v1  ;;  %v87_v5 = vld [vmem:[#allocation7 + $0x18] sm:$0xff]  ;;  %v2680_v7 = vld [vmem:[#allocation2] sm:$0xff] }
  0x4b   :  { %v127_v6 = vand.u32 4294901760, %v86_v2  ;;  %v2682_v8 = vld [vmem:[#allocation2 + $0x8] sm:$0xff]  ;;  %v130_v9 = vand.u32 4294901760, %v87_v5  ;;  %v97_v10 = vsel %vm95_vm0, %v2680_v7, 0  ;;  %v2688_v12 = vld [vmem:[#allocation2 + $0x10] sm:$0xff]  ;;  %v2690_v13 = vld [vmem:[#allocation2 + $0x18] sm:$0xff] }
  0x4c   :  { %v100_v11 = vsel %vm95_vm0, %v2682_v8, 0  ;;  %v2692_v14 = vpack.c.bf16 %v124_v4, %v121_v3  ;;  %v2694_v15 = vand.u32 4294901760, %v97_v10  ;;  %v2698_v17 = vsub.f32 %v84_v0, %v121_v3  ;;  %v2700_v18 = vld [vmem:[#allocation2 + $0x20] sm:$0xff]  ;;  %v2702_v19 = vld [vmem:[#allocation2 + $0x28] sm:$0xff]  ;;  %v2764_v48 = vld [vmem:[#allocation2 + $0x30] sm:$0xff] }
  0x4d   :  { %v2696_v16 = vand.u32 4294901760, %v100_v11  ;;  %v2704_v20 = vpack.c.bf16 %v130_v9, %v127_v6  ;;  %v2706_v21 = vsub.f32 %v85_v1, %v124_v4  ;;  %v103_v22 = vsel %vm95_vm0, %v2688_v12, 0  ;;  %v2776_v57 = vld [vmem:[#allocation2 + $0x38] sm:$0xff] }
  0x4e   :  { %v106_v23 = vsel %vm95_vm0, %v2690_v13, 0  ;;  %2227 = vmatprep.subr.bf16.mxu0 %v2692_v14  ;;  %v2714_v24 = vsub.f32 %v97_v10, %v2694_v15  ;;  %v272_v26 = vand.u32 4294901760, %v2698_v17  ;;  %v2720_v27 = vand.u32 4294901760, %v103_v22 }
  0x4f   :  { %v2717_v25 = vsub.f32 %v100_v11, %v2696_v16  ;;  %2229 = vmatpush3.bf16.msra.mxu0 %v2692_v14  ;;  %v279_v28 = vand.u32 4294901760, %v2706_v21  ;;  %v2724_v29 = vand.u32 4294901760, %v106_v23  ;;  %v109_v30 = vsel %vm95_vm0, %v2700_v18, 0 }
  0x50   :  { %v112_v31 = vsel %vm95_vm0, %v2702_v19, 0  ;;  %2231 = vmatprep.subr.bf16.mxu0 %v2704_v20  ;;  %v191_v32 = vand.u32 4294901760, %v2714_v24  ;;  %v273_v34 = vsub.f32 %v2698_v17, %v272_v26  ;;  %v2737_v35 = vsub.f32 %v103_v22, %v2720_v27 }
  0x51   :  { %v201_v33 = vand.u32 4294901760, %v2717_v25  ;;  %v280_v36 = vsub.f32 %v2706_v21, %v279_v28  ;;  %v2743_v37 = vsub.f32 %v106_v23, %v2724_v29  ;;  %v2745_v38 = vand.u32 4294901760, %v109_v30 }
  0x52   :  { %v2747_v39 = vand.u32 4294901760, %v112_v31  ;;  %v192_v40 = vsub.f32 %v2714_v24, %v191_v32  ;;  %v274_v42 = vand.u32 4294901760, %v273_v34  ;;  %v211_v43 = vand.u32 4294901760, %v2737_v35 }
  0x53   :  { %v202_v41 = vsub.f32 %v2717_v25, %v201_v33  ;;  %2233 = vmatpush3.bf16.msra.mxu0 %v2704_v20  ;;  %v281_v44 = vand.u32 4294901760, %v280_v36  ;;  %v221_v45 = vand.u32 4294901760, %v2743_v37  ;;  %v2759_v46 = vsub.f32 %v109_v30, %v2745_v38 }
  0x54   :  { %v2762_v47 = vsub.f32 %v112_v31, %v2747_v39  ;;  %v193_v49 = vand.u32 4294901760, %v192_v40  ;;  %v212_v51 = vsub.f32 %v2737_v35, %v211_v43  ;;  %v2769_v52 = vsub.f32 %v86_v2, %v127_v6 }
  0x55   :  { %v203_v50 = vand.u32 4294901760, %v202_v41  ;;  %v2234_v53 = vpack.c.bf16 %v281_v44, %v274_v42  ;;  %v222_v54 = vsub.f32 %v2743_v37, %v221_v45  ;;  %v231_v55 = vand.u32 4294901760, %v2759_v46 }
  0x56   :  { %v241_v56 = vand.u32 4294901760, %v2762_v47  ;;  %1994 = vmatprep.mubr.f32.mxu0 %v193_v49  ;;  %v213_v58 = vand.u32 4294901760, %v212_v51  ;;  %v286_v59 = vand.u32 4294901760, %v2769_v52  ;;  %v2779_v60 = vsub.f32 %v87_v5, %v130_v9 }
  0x57   :  { %v115_v61 = vsel %vm95_vm0, %v2764_v48, 0  ;;  %1995 = vmatmul.mubr.f32.vlgmr.msra.gmra.mrb[0].mxu0 %v203_v50  ;;  %2235 = vmatprep.subr.bf16.mxu0 %v2234_v53  ;;  %v223_v62 = vand.u32 4294901760, %v222_v54  ;;  %v232_v63 = vsub.f32 %v2759_v46, %v231_v55  ;;  %v118_v4 = vsel %vm95_vm0, %v2776_v57, 0 }
  0x58   :  { %v242_v0 = vsub.f32 %v2762_v47, %v241_v56  ;;  %v2789_v1 = vand.u32 4294901760, %v115_v61  ;;  %2237 = vmatpush3.bf16.msra.mxu0 %v2234_v53  ;;  %1997 = vmatprep.mubr.f32.mxu0 %v213_v58  ;;  %v287_v2 = vsub.f32 %v2769_v52, %v286_v59  ;;  %v293_v3 = vand.u32 4294901760, %v2779_v60 }
  0x59   :  { %v233_v5 = vand.u32 4294901760, %v232_v63  ;;  %v2798_v9 = vand.u32 4294901760, %v118_v4  ;;  %v2242_v41 = vpack.c.bf16 %v2706_v21, %v2698_v17  ;;  %v2246_v50 = vpack.c.bf16 %v2779_v60, %v2769_v52 }
  0x5a   :  { %v250_v6 = vsub.f32 %v115_v61, %v2789_v1  ;;  %v288_v10 = vand.u32 4294901760, %v287_v2  ;;  %v294_v11 = vsub.f32 %v2779_v60, %v293_v3  ;;  %v243_v22 = vand.u32 4294901760, %v242_v0  ;;  %v1841_v0 = vld [vmem:[%s3050_s3] ss:$0 sm:$0xff]  ;;  %s2575_s3 = smov [#allocation10]  }
  0x5b   :  { %1998 = vmatmul.mubr.f32.gmra.mrb[2].mxu0 %v223_v62  ;;  %v260_v30 = vsub.f32 %v118_v4, %v2798_v9  ;;  %v2258_v51 = vpack.c.bf16 %v279_v28, %v272_v26  ;;  %v2262_v17 = vpack.c.bf16 %v293_v3, %v286_v59  ;;  %s1830_s6 = sshll.u32 %s2575_s3, 4  ;;  %s1831_s6 = int_to_ptr.vmem [resolvable:$true] %s1830_s6 }
  0x5c   :  { %v251_v23 = vand.u32 4294901760, %v250_v6  ;;  %2000 = vmatprep.mubr.f32.mxu0 %v233_v5  ;;  %v295_v31 = vand.u32 4294901760, %v294_v11  ;;  %s2539_s1 = scalar_lea.vmem %s1831_s6, 128  ;;  %p2544_p5 = scmp.lt.s32.totalorder %s1831_s6, %s1831_s6 }
  0x5d   :  { %v261_v36 = vand.u32 4294901760, %v260_v30  ;;  %p2540_p4 = scmp.ne.s32.totalorder %s1831_s6, %s2539_s1  ;;  %p2545_p6 = scmp.lt.s32.totalorder %s2539_s1, %s2539_s1 }
  0x5e   :  { %v252_v34 = vsub.f32 %v250_v6, %v251_v23  ;;  %v2238_v40 = vpack.c.bf16 %v295_v31, %v288_v10 }
  0x5f   :  { %2001 = vmatmul.mubr.f32.gmra.mrb[4].mxu0 %v243_v22  ;;  %v262_v44 = vsub.f32 %v260_v30, %v261_v36  ;;  %p2546_p7 = por %p2545_p6, %p2544_p5 }
  0x60   :  { %v253_v42 = vand.u32 4294901760, %v252_v34  ;;  %2239 = vmatprep.subr.bf16.mxu0 %v2238_v40 }
  0x61   :  { %2241 = vmatpush3.bf16.msra.mxu0 %v2238_v40  ;;  %v263_v49 = vand.u32 4294901760, %v262_v44  ;;  %p2547_p8 = pnand %p2546_p7, %p2540_p4 }
  0x62   :  { %2003 = vmatprep.mubr.f32.mxu0 %v253_v42  ;;  %2243 = vmatprep.subr.bf16.mxu0 %v2242_v41 }
  0x63   :  { %2004 = vmatmul.mubr.f32.gmra.mrb[6].mxu0 %v263_v49 }
  0x64   :  { %2014 = vmatprep.mubr.f32.mxu0 %v2694_v15 }
  0x67   :  { %2015 = vmatmul.mubr.f32.vlgmr.msra.gmra.mrb[0].mxu0 %v2696_v16 }
  0x68   :  { %2245 = vmatpush3.bf16.msra.mxu0 %v2242_v41  ;;  %2017 = vmatprep.mubr.f32.mxu0 %v2720_v27 }
  0x69   :  { %2247 = vmatprep.subr.bf16.mxu0 %v2246_v50 }
  0x6b   :  { %2018 = vmatmul.mubr.f32.gmra.mrb[2].mxu0 %v2724_v29 }
  0x6c   :  { %2020 = vmatprep.mubr.f32.mxu0 %v2745_v38  ;;  %2249 = vmatpush3.bf16.msra.mxu0 %v2246_v50 }
  0x6d   :  { %2251 = vmatprep.subr.bf16.mxu0 %v2692_v14 }
  0x6f   :  { %2021 = vmatmul.mubr.f32.gmra.mrb[4].mxu0 %v2747_v39 }
  0x70   :  { %2023 = vmatprep.mubr.f32.mxu0 %v2789_v1 }
  0x73   :  { %2024 = vmatmul.mubr.f32.gmra.mrb[6].mxu0 %v2798_v9 }
  0x74   :  { %2034 = vmatprep.mubr.f32.mxu0 %v2714_v24 }
  0x77   :  { %2035 = vmatmul.mubr.f32.vlgmr.msra.gmra.mrb[0].mxu0 %v2717_v25  ;;  %v916_v25 = vld [vmem:[#allocation8 + $0x10] sm:$0xff] }
  0x78   :  { %2253 = vmatpush3.bf16.msra.mxu0 %v2692_v14  ;;  %2037 = vmatprep.mubr.f32.mxu0 %v2737_v35 }
  0x79   :  { %2255 = vmatprep.subr.bf16.mxu0 %v2704_v20 }
  0x7b   :  { %2038 = vmatmul.mubr.f32.gmra.mrb[2].mxu0 %v2743_v37 }
  0x7c   :  { %2040 = vmatprep.mubr.f32.mxu0 %v2759_v46  ;;  %2257 = vmatpush3.bf16.msra.mxu0 %v2704_v20 }
  0x7d   :  { %2259 = vmatprep.subr.bf16.mxu0 %v2258_v51 }
  0x7f   :  { %2041 = vmatmul.mubr.f32.gmra.mrb[4].mxu0 %v2762_v47 }
  0x80   :  { %2043 = vmatprep.mubr.f32.mxu0 %v250_v6 }
  0x83   :  { %2044 = vmatmul.mubr.f32.gmra.mrb[6].mxu0 %v260_v30 }
  0x84   :  { %2054 = vmatprep.mubr.f32.mxu0 %v191_v32 }
  0x87   :  { %2055 = vmatmul.mubr.f32.vlgmr.msra.gmra.mrb[0].mxu0 %v201_v33 }
  0x88   :  { %2261 = vmatpush3.bf16.msra.mxu0 %v2258_v51  ;;  %2057 = vmatprep.mubr.f32.mxu0 %v211_v43 }
  0x89   :  { %2263 = vmatprep.subr.bf16.mxu0 %v2262_v17 }
  0x8b   :  { %2058 = vmatmul.mubr.f32.gmra.mrb[2].mxu0 %v221_v45 }
  0x8c   :  { %2060 = vmatprep.mubr.f32.mxu0 %v231_v55  ;;  %2265 = vmatpush3.bf16.msra.mxu0 %v2262_v17 }
  0x8d   :  { %2267 = vmatprep.subr.bf16.mxu0 %v2692_v14 }
  0x8f   :  { %2061 = vmatmul.mubr.f32.gmra.mrb[4].mxu0 %v241_v56 }
  0x90   :  { %2063 = vmatprep.mubr.f32.mxu0 %v251_v23 }
  0x93   :  { %2064 = vmatmul.mubr.f32.gmra.mrb[6].mxu0 %v261_v36 }
  0x94   :  { %2074 = vmatprep.mubr.f32.mxu0 %v2694_v15 }
  0x97   :  { %2075 = vmatmul.mubr.f32.vlgmr.msra.gmra.mrb[0].mxu0 %v2696_v16 }
  0x98   :  { %2269 = vmatpush3.bf16.msra.mxu0 %v2692_v14  ;;  %2077 = vmatprep.mubr.f32.mxu0 %v2720_v27  ;;  %v914_v14 = vld [vmem:[#allocation8] sm:$0xff] }
  0x99   :  { %2271 = vmatprep.subr.bf16.mxu0 %v2704_v20  ;;  %v943_v21 = vand.u32 4294901760, %v914_v14 }
  0x9b   :  { %2078 = vmatmul.mubr.f32.gmra.mrb[2].mxu0 %v2724_v29 }
  0x9c   :  { %2080 = vmatprep.mubr.f32.mxu0 %v2745_v38  ;;  %2273 = vmatpush3.bf16.msra.mxu0 %v2704_v20  ;;  %v915_v20 = vld [vmem:[#allocation8 + $0x8] sm:$0xff] }
  0x9d   :  { %v946_v24 = vand.u32 4294901760, %v915_v20 }
  0x9f   :  { %2081 = vmatmul.mubr.f32.gmra.mrb[4].mxu0 %v2747_v39  ;;  %v2862_v26 = vpack.c.bf16 %v946_v24, %v943_v21  ;;  %v1100_v32 = vsub.f32 %v915_v20, %v946_v24 }
  0xa0   :  { %2083 = vmatprep.mubr.f32.mxu0 %v2789_v1 }
  0xa1   :  { %2275 = vmatprep.subr.bf16.mxu1 %v2862_v26  ;;  %v1101_v35 = vand.u32 4294901760, %v1100_v32 }
  0xa2   :  { %2277 = vmatpush3.bf16.msra.mxu1 %v2862_v26 }
  0xa3   :  { %2084 = vmatmul.mubr.f32.gmra.mrb[6].mxu0 %v2798_v9 }
  0xa4   :  { %2094 = vmatprep.mubr.f32.mxu0 %v2694_v15  ;;  %v917_v15 = vld [vmem:[#allocation8 + $0x18] sm:$0xff] }
  0xa7   :  { %2095 = vmatmul.mubr.f32.vlgmr.msra.gmra.mrb[0].mxu0 %v2696_v16  ;;  %v949_v16 = vand.u32 4294901760, %v916_v25 }
  0xa8   :  { %2097 = vmatprep.mubr.f32.mxu0 %v2720_v27  ;;  %v952_v27 = vand.u32 4294901760, %v917_v15 }
  0xaa   :  { %v2865_v28 = vpack.c.bf16 %v952_v27, %v949_v16  ;;  %v1114_v43 = vsub.f32 %v917_v15, %v952_v27 }
  0xab   :  { %2098 = vmatmul.mubr.f32.gmra.mrb[2].mxu0 %v2724_v29  ;;  %v1093_v29 = vsub.f32 %v914_v14, %v943_v21 }
  0xac   :  { %2100 = vmatprep.mubr.f32.mxu0 %v2745_v38  ;;  %2279 = vmatprep.subr.bf16.mxu1 %v2865_v28  ;;  %v1102_v38 = vsub.f32 %v1100_v32, %v1101_v35  ;;  %v1115_v52 = vand.u32 4294901760, %v1114_v43 }
  0xad   :  { %2281 = vmatpush3.bf16.msra.mxu1 %v2865_v28  ;;  %v1094_v33 = vand.u32 4294901760, %v1093_v29  ;;  %v2875_v60 = vpack.c.bf16 %v1100_v32, %v1093_v29 }
  0xae   :  { %v1103_v46 = vand.u32 4294901760, %v1102_v38  ;;  %v1116_v55 = vsub.f32 %v1114_v43, %v1115_v52 }
  0xaf   :  { %2101 = vmatmul.mubr.f32.gmra.mrb[4].mxu0 %v2747_v39  ;;  %v1095_v37 = vsub.f32 %v1093_v29, %v1094_v33  ;;  %v1107_v39 = vsub.f32 %v916_v25, %v949_v16  ;;  %v2879_v62 = vpack.c.bf16 %v1101_v35, %v1094_v33 }
  0xb0   :  { %2103 = vmatprep.mubr.f32.mxu0 %v2789_v1  ;;  %v1117_v58 = vand.u32 4294901760, %v1116_v55 }
  0xb1   :  { %v1096_v45 = vand.u32 4294901760, %v1095_v37  ;;  %v1108_v47 = vand.u32 4294901760, %v1107_v39  ;;  %v2877_v61 = vpack.c.bf16 %v1114_v43, %v1107_v39 }
  0xb3   :  { %2104 = vmatmul.mubr.f32.gmra.mrb[6].mxu0 %v2798_v9  ;;  %v2870_v53 = vpack.c.bf16 %v1103_v46, %v1096_v45  ;;  %v1109_v54 = vsub.f32 %v1107_v39, %v1108_v47  ;;  %v2881_v63 = vpack.c.bf16 %v1115_v52, %v1108_v47 }
  0xb5   :  { %2283 = vmatprep.subr.bf16.mxu1 %v2870_v53  ;;  %v1110_v56 = vand.u32 4294901760, %v1109_v54 }
  0xb7   :  { %v2873_v59 = vpack.c.bf16 %v1117_v58, %v1110_v56 }
 0x17a   :  { %v2096_v1 = vpop.f32.mrb[0].mxu0 }
 0x17b   :  { %v2322_v2 = vadd.f32 %v2096_v1, %v1841_v0  ;;  %v860_v3 = vpop.f32.mrb[1].mxu0 }
 0x17c   :  { %v2323_v4 = vadd.f32 %v1841_v0, %v860_v3 }
 0x17d   :  { %2417 = vtanh.f32 %v2322_v2 }
 0x17e   :  { %2419 = vtanh.f32 %v2323_v4  ;;  %v2099_v5 = vpop.f32.mrb[2].mxu0 }
 0x17f   :  { %v2324_v6 = vadd.f32 %v2099_v5, %v1841_v0  ;;  %v872_v9 = vpop.f32.mrb[3].mxu0 }
 0x180   :  { %v2325_v10 = vadd.f32 %v1841_v0, %v872_v9 }
 0x181   :  { %2421 = vtanh.f32 %v2324_v6 }
 0x182   :  { %2423 = vtanh.f32 %v2325_v10  ;;  %v2102_v11 = vpop.f32.mrb[4].mxu0 }
 0x183   :  { %v2326_v22 = vadd.f32 %v2102_v11, %v1841_v0  ;;  %v884_v23 = vpop.f32.mrb[5].mxu0 }
 0x184   :  { %v2327_v30 = vadd.f32 %v1841_v0, %v884_v23 }
 0x185   :  { %2425 = vtanh.f32 %v2326_v22 }
 0x186   :  { %2427 = vtanh.f32 %v2327_v30  ;;  %v2105_v31 = vpop.f32.mrb[6].mxu0 }
 0x187   :  { %v2418_v34 = vpop.eup %2417  ;;  %v2328_v36 = vadd.f32 %v2105_v31, %v1841_v0  ;;  %v896_v40 = vpop.f32.mrb[7].mxu0 }
 0x188   :  { %v2420_v41 = vpop.eup %2419  ;;  %v2329_v42 = vadd.f32 %v1841_v0, %v896_v40  ;;  %v922_v44 = vsel %vm95_vm0, %v2418_v34, 0 }
 0x189   :  { %2429 = vtanh.f32 %v2328_v36  ;;  %v919_v49 = vsel %vm95_vm0, %v2420_v41, 0  ;;  %v2888_v50 = vand.u32 4294901760, %v922_v44 }
 0x18a   :  { %2431 = vtanh.f32 %v2329_v42  ;;  %v2890_v51 = vand.u32 4294901760, %v919_v49 }
 0x18b   :  { %v2422_v17 = vpop.eup %2421  ;;  %v2893_v14 = vsub.f32 %v922_v44, %v2888_v50 }
 0x18c   :  { %v2424_v20 = vpop.eup %2423  ;;  %v2896_v21 = vsub.f32 %v919_v49, %v2890_v51  ;;  %v928_v24 = vsel %vm95_vm0, %v2422_v17, 0 }
 0x18d   :  { %v1023_v25 = vand.u32 4294901760, %v2893_v14  ;;  %v925_v15 = vsel %vm95_vm0, %v2424_v20, 0  ;;  %v2901_v16 = vand.u32 4294901760, %v928_v24 }
 0x18e   :  { %v1013_v27 = vand.u32 4294901760, %v2896_v21  ;;  %v2904_v29 = vand.u32 4294901760, %v925_v15 }
 0x18f   :  { %v2426_v32 = vpop.eup %2425  ;;  %v1024_v33 = vsub.f32 %v2893_v14, %v1023_v25  ;;  %v2910_v35 = vsub.f32 %v928_v24, %v2901_v16 }
 0x190   :  { %v2428_v37 = vpop.eup %2427  ;;  %v1014_v38 = vsub.f32 %v2896_v21, %v1013_v27  ;;  %v2916_v39 = vsub.f32 %v925_v15, %v2904_v29  ;;  %v934_v43 = vsel %vm95_vm0, %v2426_v32, 0  ;;  %v1730_v15 = vld [vmem:[#allocation5 + $0x10] sm:$0xff]  ;;  %v1735_v32 = vld [vmem:[#allocation5 + $0x38] sm:$0xff] }
 0x191   :  { %v1043_v45 = vand.u32 4294901760, %v2910_v35  ;;  %v931_v46 = vsel %vm95_vm0, %v2428_v37, 0  ;;  %v2921_v47 = vand.u32 4294901760, %v934_v43  ;;  %v1025_v58 = vand.u32 4294901760, %v1024_v33 }
 0x192   :  { %v1015_v52 = vand.u32 4294901760, %v1014_v38  ;;  %v1033_v54 = vand.u32 4294901760, %v2916_v39  ;;  %v2924_v55 = vand.u32 4294901760, %v931_v46  ;;  %v1734_v38 = vld [vmem:[#allocation5 + $0x30] sm:$0xff] }
 0x193   :  { %v2430_v56 = vpop.eup %2429  ;;  %v1044_v0 = vsub.f32 %v2910_v35, %v1043_v45  ;;  %v2930_v1 = vsub.f32 %v934_v43, %v2921_v47 }
 0x194   :  { %v2432_v2 = vpop.eup %2431  ;;  %2114 = vmatprep.mubr.f32.mxu1 %v1015_v52  ;;  %v1034_v3 = vsub.f32 %v2916_v39, %v1033_v54  ;;  %v1052_v4 = vsub.f32 %v931_v46, %v2924_v55  ;;  %v940_v5 = vsel %vm95_vm0, %v2430_v56, 0 }
 0x195   :  { %2115 = vmatmul.mubr.f32.vlgmr.msra.gmra.mrb[0].mxu1 %v1025_v58  ;;  %v1063_v6 = vand.u32 4294901760, %v2930_v1  ;;  %v937_v9 = vsel %vm95_vm0, %v2432_v2, 0  ;;  %v2939_v10 = vand.u32 4294901760, %v940_v5  ;;  %v1045_v30 = vand.u32 4294901760, %v1044_v0 }
 0x196   :  { %2285 = vmatpush3.bf16.msra.mxu1 %v2870_v53  ;;  %v1035_v11 = vand.u32 4294901760, %v1034_v3  ;;  %v1053_v22 = vand.u32 4294901760, %v1052_v4  ;;  %v2942_v23 = vand.u32 4294901760, %v937_v9 }
 0x197   :  { %v1064_v31 = vsub.f32 %v2930_v1, %v1063_v6  ;;  %2287 = vmatprep.subr.bf16.mxu1 %v2873_v59  ;;  %v1082_v34 = vsub.f32 %v940_v5, %v2939_v10 }
 0x198   :  { %2117 = vmatprep.mubr.f32.mxu1 %v1035_v11  ;;  %v1054_v36 = vsub.f32 %v1052_v4, %v1053_v22  ;;  %v1072_v40 = vsub.f32 %v937_v9, %v2942_v23 }
 0x199   :  { %2118 = vmatmul.mubr.f32.gmra.mrb[2].mxu1 %v1045_v30  ;;  %v1083_v41 = vand.u32 4294901760, %v1082_v34  ;;  %v1065_v44 = vand.u32 4294901760, %v1064_v31 }
 0x19a   :  { %v1055_v42 = vand.u32 4294901760, %v1054_v36  ;;  %2289 = vmatpush3.bf16.msra.mxu1 %v2873_v59  ;;  %v1073_v53 = vand.u32 4294901760, %v1072_v40  ;;  %v1729_v59 = vld [vmem:[#allocation5 + $0x8] sm:$0xff] }
 0x19b   :  { %v1084_v49 = vsub.f32 %v1082_v34, %v1083_v41  ;;  %2291 = vmatprep.subr.bf16.mxu1 %v2875_v60 }
 0x19c   :  { %2120 = vmatprep.mubr.f32.mxu1 %v1055_v42  ;;  %v1074_v17 = vsub.f32 %v1072_v40, %v1073_v53 }
 0x19d   :  { %2121 = vmatmul.mubr.f32.gmra.mrb[4].mxu1 %v1065_v44  ;;  %v1085_v24 = vand.u32 4294901760, %v1084_v49 }
 0x19e   :  { %v1075_v20 = vand.u32 4294901760, %v1074_v17 }
 0x1a0   :  { %2123 = vmatprep.mubr.f32.mxu1 %v1075_v20 }
 0x1a1   :  { %2124 = vmatmul.mubr.f32.gmra.mrb[6].mxu1 %v1085_v24 }
 0x1a2   :  { %2134 = vmatprep.mubr.f32.mxu1 %v2890_v51 }
 0x1a5   :  { %2135 = vmatmul.mubr.f32.vlgmr.msra.gmra.mrb[0].mxu1 %v2888_v50 }
 0x1a6   :  { %2137 = vmatprep.mubr.f32.mxu1 %v2904_v29  ;;  %2293 = vmatpush3.bf16.msra.mxu1 %v2875_v60 }
 0x1a7   :  { %2295 = vmatprep.subr.bf16.mxu1 %v2877_v61 }
 0x1a9   :  { %2138 = vmatmul.mubr.f32.gmra.mrb[2].mxu1 %v2901_v16 }
 0x1aa   :  { %2140 = vmatprep.mubr.f32.mxu1 %v2924_v55  ;;  %2297 = vmatpush3.bf16.msra.mxu1 %v2877_v61  ;;  %v1728_v61 = vld [vmem:[#allocation5] sm:$0xff] }
 0x1ab   :  { %2299 = vmatprep.subr.bf16.mxu1 %v2862_v26 }
 0x1ad   :  { %2141 = vmatmul.mubr.f32.gmra.mrb[4].mxu1 %v2921_v47 }
 0x1ae   :  { %2143 = vmatprep.mubr.f32.mxu1 %v2942_v23 }
 0x1b1   :  { %2144 = vmatmul.mubr.f32.gmra.mrb[6].mxu1 %v2939_v10 }
 0x1b2   :  { %2154 = vmatprep.mubr.f32.mxu1 %v2896_v21  ;;  %v1731_v21 = vld [vmem:[#allocation5 + $0x18] sm:$0xff] }
 0x1b5   :  { %2155 = vmatmul.mubr.f32.vlgmr.msra.gmra.mrb[0].mxu1 %v2893_v14 }
 0x1b6   :  { %2157 = vmatprep.mubr.f32.mxu1 %v2916_v39  ;;  %2301 = vmatpush3.bf16.msra.mxu1 %v2862_v26 }
 0x1b7   :  { %2303 = vmatprep.subr.bf16.mxu1 %v2865_v28 }
 0x1b9   :  { %2158 = vmatmul.mubr.f32.gmra.mrb[2].mxu1 %v2910_v35 }
 0x1ba   :  { %2160 = vmatprep.mubr.f32.mxu1 %v1052_v4  ;;  %2305 = vmatpush3.bf16.msra.mxu1 %v2865_v28 }
 0x1bb   :  { %2307 = vmatprep.subr.bf16.mxu1 %v2879_v62 }
 0x1bd   :  { %2161 = vmatmul.mubr.f32.gmra.mrb[4].mxu1 %v2930_v1 }
 0x1be   :  { %2163 = vmatprep.mubr.f32.mxu1 %v1072_v40 }
 0x1c1   :  { %2164 = vmatmul.mubr.f32.gmra.mrb[6].mxu1 %v1082_v34 }
 0x1c2   :  { %2174 = vmatprep.mubr.f32.mxu1 %v1013_v27 }
 0x1c5   :  { %2175 = vmatmul.mubr.f32.vlgmr.msra.gmra.mrb[0].mxu1 %v1023_v25 }
 0x1c6   :  { %2177 = vmatprep.mubr.f32.mxu1 %v1033_v54  ;;  %2309 = vmatpush3.bf16.msra.mxu1 %v2879_v62 }
 0x1c7   :  { %2311 = vmatprep.subr.bf16.mxu1 %v2881_v63 }
 0x1c9   :  { %2178 = vmatmul.mubr.f32.gmra.mrb[2].mxu1 %v1043_v45 }
 0x1ca   :  { %2180 = vmatprep.mubr.f32.mxu1 %v1053_v22  ;;  %2313 = vmatpush3.bf16.msra.mxu1 %v2881_v63  ;;  %v1733_v63 = vld [vmem:[#allocation5 + $0x28] sm:$0xff] }
 0x1cb   :  { %2315 = vmatprep.subr.bf16.mxu1 %v2862_v26 }
 0x1cd   :  { %2181 = vmatmul.mubr.f32.gmra.mrb[4].mxu1 %v1063_v6 }
 0x1ce   :  { %2183 = vmatprep.mubr.f32.mxu1 %v1073_v53 }
 0x1d1   :  { %2184 = vmatmul.mubr.f32.gmra.mrb[6].mxu1 %v1083_v41 }
 0x1d2   :  { %2194 = vmatprep.mubr.f32.mxu1 %v2890_v51 }
 0x1d5   :  { %2195 = vmatmul.mubr.f32.vlgmr.msra.gmra.mrb[0].mxu1 %v2888_v50 }
 0x1d6   :  { %2197 = vmatprep.mubr.f32.mxu1 %v2904_v29  ;;  %2317 = vmatpush3.bf16.msra.mxu1 %v2862_v26 }
 0x1d7   :  { %2319 = vmatprep.subr.bf16.mxu1 %v2865_v28 }
 0x1d9   :  { %2198 = vmatmul.mubr.f32.gmra.mrb[2].mxu1 %v2901_v16 }
 0x1da   :  { %2200 = vmatprep.mubr.f32.mxu1 %v2924_v55  ;;  %2321 = vmatpush3.bf16.msra.mxu1 %v2865_v28 }
 0x1dd   :  { %2201 = vmatmul.mubr.f32.gmra.mrb[4].mxu1 %v2921_v47 }
 0x1de   :  { %2203 = vmatprep.mubr.f32.mxu1 %v2942_v23 }
 0x1e1   :  { %2204 = vmatmul.mubr.f32.gmra.mrb[6].mxu1 %v2939_v10 }
 0x1e2   :  { %2214 = vmatprep.mubr.f32.mxu1 %v2890_v51  ;;  %v1732_v51 = vld [vmem:[#allocation5 + $0x20] sm:$0xff] }
 0x1e5   :  { %2215 = vmatmul.mubr.f32.vlgmr.msra.gmra.mrb[0].mxu1 %v2888_v50 }
 0x1e6   :  { %2217 = vmatprep.mubr.f32.mxu1 %v2904_v29 }
 0x1e9   :  { %2218 = vmatmul.mubr.f32.gmra.mrb[2].mxu1 %v2901_v16 }
 0x1ea   :  { %2220 = vmatprep.mubr.f32.mxu1 %v2924_v55 }
 0x1ed   :  { %2221 = vmatmul.mubr.f32.gmra.mrb[4].mxu1 %v2921_v47 }
 0x1ee   :  { %2223 = vmatprep.mubr.f32.mxu1 %v2942_v23 }
 0x1f1   :  { %2224 = vmatmul.mubr.f32.gmra.mrb[6].mxu1 %v2939_v10 }
 0x2b8   :  { %v2216_v26 = vpop.f32.mrb[0].mxu1 }
 0x2b9   :  { %v1682_v28 = vpop.f32.mrb[1].mxu1  ;;  %v1737_v50 = vadd.f32 %v2216_v26, %v1729_v59 }
 0x2ba   :  { %v1736_v14 = vadd.f32 %v1728_v61, %v1682_v28 }
 0x2bb   :  { %v1745_v33 = vsel %vm95_vm0, %v1737_v50, -inf }
 0x2bc   :  { %v2219_v60 = vpop.f32.mrb[2].mxu1  ;;  %v1744_v39 = vsel %vm95_vm0, %v1736_v14, -inf }
 0x2bd   :  { %v1694_v62 = vpop.f32.mrb[3].mxu1  ;;  %v1739_v35 = vadd.f32 %v2219_v60, %v1731_v21 }
 0x2be   :  { %v1738_v43 = vadd.f32 %v1730_v15, %v1694_v62 }
 0x2bf   :  { %v1747_v58 = vsel %vm95_vm0, %v1739_v35, -inf }
 0x2c0   :  { %v2222_v25 = vpop.f32.mrb[4].mxu1  ;;  %v1746_v2 = vsel %vm95_vm0, %v1738_v43, -inf }
 0x2c1   :  { %v1741_v16 = vadd.f32 %v2222_v25, %v1733_v63  ;;  %v1706_v27 = vpop.f32.mrb[5].mxu1 }
 0x2c2   :  { %v1740_v29 = vadd.f32 %v1732_v51, %v1706_v27 }
 0x2c3   :  { %v1750_v37 = vsel %vm95_vm0, %v1741_v16, -inf }
 0x2c4   :  { %v1751_v45 = vmax.f32 %v1745_v33, %v1750_v37  ;;  %v1748_v46 = vsel %vm95_vm0, %v1740_v29, -inf  ;;  %v2225_v47 = vpop.f32.mrb[6].mxu1 }
 0x2c5   :  { %v1749_v52 = vmax.f32 %v1744_v39, %v1748_v46  ;;  %v1743_v54 = vadd.f32 %v2225_v47, %v1735_v32  ;;  %v1718_v55 = vpop.f32.mrb[7].mxu1 }
 0x2c6   :  { %v1742_v56 = vadd.f32 %v1734_v38, %v1718_v55 }
 0x2c7   :  { %v1756_v0 = vmax.f32 %v1749_v52, %v1751_v45  ;;  %v1754_v1 = vsel %vm95_vm0, %v1743_v54, -inf }
 0x2c8   :  { %v1755_v3 = vmax.f32 %v1747_v58, %v1754_v1  ;;  %v1752_v4 = vsel %vm95_vm0, %v1742_v56, -inf }
 0x2c9   :  { %v1753_v5 = vmax.f32 %v1746_v2, %v1752_v4 }
 0x2cb   :  { %v1757_v6 = vmax.f32 %v1753_v5, %v1755_v3 }
 0x2cd   :  { %v1758_v9 = vmax.f32 %v1756_v0, %v1757_v6 }
 0x2cf   :  { %v1759_v10 = vsub.f32 %v1736_v14, %v1758_v9  ;;  %v1760_v11 = vsub.f32 %v1737_v50, %v1758_v9  ;;  %v1761_v22 = vsub.f32 %v1738_v43, %v1758_v9  ;;  %v1762_v23 = vsub.f32 %v1739_v35, %v1758_v9 }
 0x2d0   :  { %v1763_v30 = vsub.f32 %v1740_v29, %v1758_v9  ;;  %v1764_v31 = vsub.f32 %v1741_v16, %v1758_v9  ;;  %v1765_v34 = vsub.f32 %v1742_v56, %v1758_v9  ;;  %v1766_v36 = vsub.f32 %v1743_v54, %v1758_v9 }
 0x2d1   :  { %v1767_v40 = vmul.f32 1.442695, %v1759_v10  ;;  %v1769_v41 = vmul.f32 1.442695, %v1760_v11  ;;  %v1771_v42 = vmul.f32 1.442695, %v1761_v22 }
 0x2d2   :  { %v1773_v53 = vmul.f32 1.442695, %v1762_v23  ;;  %v1775_v44 = vmul.f32 1.442695, %v1763_v30  ;;  %v1777_v49 = vmul.f32 1.442695, %v1764_v31 }
 0x2d3   :  { %2433 = vpow2.f32 %v1767_v40  ;;  %v1779_v17 = vmul.f32 1.442695, %v1765_v34  ;;  %v1781_v20 = vmul.f32 1.442695, %v1766_v36 }
 0x2d4   :  { %2435 = vpow2.f32 %v1769_v41 }
 0x2d5   :  { %2437 = vpow2.f32 %v1771_v42 }
 0x2d6   :  { %2439 = vpow2.f32 %v1773_v53 }
 0x2d7   :  { %2441 = vpow2.f32 %v1775_v44 }
 0x2d8   :  { %2443 = vpow2.f32 %v1777_v49 }
 0x2d9   :  { %2445 = vpow2.f32 %v1779_v17 }
 0x2da   :  { %2447 = vpow2.f32 %v1781_v20 }
 0x2dd   :  { %v2434_v24 = vpop.eup %2433 }
 0x2de   :  { %v2436_v26 = vpop.eup %2435  ;;  %v1783_v28 = vsel %vm95_vm0, %v2434_v24, 0.0  ;;  %v1799_v59 = vmul.f32 %v2434_v24, %v2680_v7 }
 0x2df   :  { %v2438_v60 = vpop.eup %2437  ;;  %v1784_v61 = vsel %vm95_vm0, %v2436_v26, 0.0  ;;  %v1800_v62 = vmul.f32 %v2436_v26, %v2682_v8 }
 0x2e0   :  { %v2440_v63 = vpop.eup %2439  ;;  %v1785_v50 = vadd.f32 %v1784_v61, %v1783_v28  ;;  %v1801_v51 = vmul.f32 %v2438_v60, %v2688_v12  ;;  %v1807_v14 = vsel %vm95_vm0, %v1799_v59, 0.0  ;;  %v1786_v25 = vsel %vm95_vm0, %v2438_v60, 0.0 }
 0x2e1   :  { %v2442_v21 = vpop.eup %2441  ;;  %v1802_v15 = vmul.f32 %v2440_v63, %v2690_v13  ;;  %v1808_v16 = vsel %vm95_vm0, %v1800_v62, 0.0  ;;  %v1788_v32 = vsel %vm95_vm0, %v2440_v63, 0.0 }
 0x2e2   :  { %v2444_v27 = vpop.eup %2443  ;;  %v1787_v7 = vadd.f32 %v1786_v25, %v1785_v50  ;;  %v1809_v29 = vadd.f32 %v1808_v16, %v1807_v14  ;;  %v1803_v8 = vmul.f32 %v2442_v21, %v2700_v18  ;;  %v1810_v33 = vsel %vm95_vm0, %v1801_v51, 0.0 }
 0x2e3   :  { %v2446_v35 = vpop.eup %2445  ;;  %v1790_v38 = vsel %vm95_vm0, %v2442_v21, 0.0  ;;  %v1804_v39 = vmul.f32 %v2444_v27, %v2702_v19  ;;  %v1812_v13 = vsel %vm95_vm0, %v1802_v15, 0.0  ;;  %v1792_v47 = vsel %vm95_vm0, %v2444_v27, 0.0 }
 0x2e4   :  { %v1789_v12 = vadd.f32 %v1788_v32, %v1787_v7  ;;  %v1811_v37 = vadd.f32 %v1810_v33, %v1809_v29  ;;  %v2448_v43 = vpop.eup %2447  ;;  %v1805_v52 = vmul.f32 %v2446_v35, %v2764_v48  ;;  %v1814_v18 = vsel %vm95_vm0, %v1803_v8, 0.0 }
 0x2e5   :  { %v1794_v56 = vsel %vm95_vm0, %v2446_v35, 0.0  ;;  %v1806_v58 = vmul.f32 %v2448_v43, %v2776_v57  ;;  %v1816_v0 = vsel %vm95_vm0, %v1804_v39, 0.0  ;;  %v1796_v2 = vsel %vm95_vm0, %v2448_v43, 0.0 }
 0x2e6   :  { %v1791_v45 = vadd.f32 %v1790_v38, %v1789_v12  ;;  %v1813_v46 = vadd.f32 %v1812_v13, %v1811_v37  ;;  %v1818_v3 = vsel %vm95_vm0, %v1805_v52, 0.0 }
 0x2e7   :  { %v1820_v48 = vsel %vm95_vm0, %v1806_v58, 0.0 }
 0x2e8   :  { %v1793_v54 = vadd.f32 %v1792_v47, %v1791_v45  ;;  %v1815_v55 = vadd.f32 %v1814_v18, %v1813_v46 }
 0x2ea   :  { %v1795_v19 = vadd.f32 %v1794_v56, %v1793_v54  ;;  %v1817_v1 = vadd.f32 %v1816_v0, %v1815_v55 }
 0x2ec   :  { %v1797_v4 = vadd.f32 %v1796_v2, %v1795_v19  ;;  %v1819_v5 = vadd.f32 %v1818_v3, %v1817_v1 }
 0x2ee   :  { %2449 = vrcp.f32 %v1797_v4  ;;  %v1821_v6 = vadd.f32 %v1820_v48, %v1819_v5 }
 0x2f8   :  { %v2450_v9 = vpop.eup %2449 }
 0x2f9   :  { %v1822_v10 = vmul.f32 %v2450_v9, %v1821_v6 }
 0x2fb   :  { %1823 = vst.msk [vmem:[#allocation10] sm:$0xff] %vm95_vm0, %v1822_v10 }
 0x2fc   :  { %2550 = shalt.err (!%p2547_p8)
}
 0x2fd   :  { %s2551_s19 = scalar_lea.hbm %s3052_s5, 128 }
 0x2fe   :  { %p2552_p9 = scmp.ne.s32.totalorder %s3052_s5, %s2551_s19  ;;  %p2555_p10 = scmp.lt.u32.totalorder %s2551_s19, %s3052_s5 }
 0x300   :  { %p2557_p11 = pnand %p2555_p10, %p2552_p9 }
 0x302   :  { %2560 = shalt.err (!%p2557_p11)
}
 0x303   :  { %1833 = dma.vmem_to_hbm [thread:$0]  %s1831_s6, 128, %s3052_s5, [#allocation4]  }
 0x304   :  { %2567 = dma.done.wait [#allocation4], 128  }
 0x305   :  { %2568 = vsyncadd [#allocation4], 4294967168 }
 0x306   :  { %1837 = vsyncpa [#allocation3], 1 }
 0x307   :  { %1838 = vsyncpa [#allocation6], 1 }
 0x308   :  { %1839 = vsyncpa [#allocation9], 1 }
 0x309   :  { %1840 = vsyncpa [#allocation4], 1 }

</bundles_post_ra>
